<compile_context>
chip_gen: v7x
topology: tpu7x:2x2x1
jax: 0.10.0
libtpu: 0.0.40
codegen_flags: <defaults>
</compile_context>

<pallas_src>
import functools

import jax
import jax.numpy as jnp
from jax.experimental import pallas as pl
from jax.experimental.pallas import tpu as pltpu

IN_DIM = 2      # input_length in the PyTorch module
HIDDEN = 8      # fc1/fc2/fc3 width
OUT_DIM = 1     # output_layer width
SLOT = 8        # lanes per packed example (max layer width)
PACK = 16       # examples packed per 128-lane row
F = SLOT * PACK  # 128


def _mlp_kernel(x_ref, w1_ref, w2_ref, w3_ref, w4_ref, b_ref,
                a1_ref, a2_ref, a3_ref, h4_ref):
    # Every ref is lane-dense (last dim 128).  Weights are block-diagonal
    # (16 copies of the real layer on the diagonal), so one 128-wide matmul
    # applies the layer independently to all 16 examples packed in a row.
    x = x_ref[...]
    a1 = jnp.tanh(jnp.dot(x, w1_ref[...], preferred_element_type=jnp.float32)
                  + b_ref[0:1, :])
    a2 = jnp.tanh(jnp.dot(a1, w2_ref[...], preferred_element_type=jnp.float32)
                  + b_ref[1:2, :])
    a3 = jnp.tanh(jnp.dot(a2, w3_ref[...], preferred_element_type=jnp.float32)
                  + b_ref[2:3, :])
    # Output layer: only lane 8p of each 8-lane slot is live (OUT_DIM=1); the
    # other lanes are exactly zero (zero weight columns + zero bias lanes).
    h4 = jnp.dot(a3, w4_ref[...], preferred_element_type=jnp.float32) + b_ref[3:4, :]
    a1_ref[...] = a1
    a2_ref[...] = a2
    a3_ref[...] = a3
    h4_ref[...] = h4


def _round_up(n, m):
    return ((n + m - 1) // m) * m


def _block_diag(w):
    """[fan_in<=8, fan_out<=8] weight -> (128,128) with PACK copies on the diagonal.

    Unused lanes are exactly zero (required so packed slots never cross-talk).
    """
    fan_in, fan_out = w.shape
    blk = jnp.zeros((SLOT, SLOT), jnp.float32).at[:fan_in, :fan_out].set(
        w.astype(jnp.float32))
    return jnp.kron(jnp.eye(PACK, dtype=jnp.float32), blk)


def _tiled_bias(b):
    """[1, fan_out<=8] bias -> (1,128) repeated per 8-lane slot, zero elsewhere."""
    fan_out = b.shape[-1]
    blk = jnp.zeros((1, SLOT), jnp.float32).at[:, :fan_out].set(
        b.reshape(1, -1).astype(jnp.float32))
    return jnp.tile(blk, (1, PACK))


def pack_params(params):
    """One-time weight prep, hoisted out of the jitted forward."""
    (w1, b1), (w2, b2), (w3, b3), (w4, b4) = params
    ws = tuple(_block_diag(w) for w in (w1, w2, w3, w4))
    b = jnp.concatenate([_tiled_bias(b) for b in (b1, b2, b3, b4)], axis=0)  # (4,128)
    return ws + (b,)


@functools.partial(jax.jit, static_argnames=("tile_rows",))
def visualization_model_forward(x, packed_params, tile_rows=256):
    """Returns (x_out, features): x_out == module return value (B, 1);
    features == the module's `outputs` list [tanh(fc1), tanh(fc2), tanh(fc3), tanh(out)]."""
    w1, w2, w3, w4, b = packed_params
    x = x.astype(jnp.float32)
    B = x.shape[0]

    # 16 examples per packed 128-lane row.
    rows_needed = pl.cdiv(B, PACK)
    # At least 2 (even number of) grid steps so the "parallel" batch axis can be
    # sharded across both v7x TensorCores; tile_rows=256 (=4096 examples) keeps
    # the ~0.35us per-step overhead amortized at large batch.
    ntiles = max(2, pl.cdiv(rows_needed, tile_rows))
    ntiles += ntiles % 2
    tr = max(8, _round_up(pl.cdiv(rows_needed, ntiles), 8))
    R = ntiles * tr
    Bp = R * PACK

    # Pack: example 16r+p -> lanes [8p:8p+8) of row r (features in lanes 0..1 of
    # its slot, zeros elsewhere).  Padded rows are zeros and sliced off below.
    xp = jnp.pad(x, ((0, Bp - B), (0, SLOT - IN_DIM))).reshape(R, F)

    const = lambda i: (0, 0)              # weights/biases stay VMEM-resident
    row_tile = pl.BlockSpec((tr, F), lambda i: (i, 0))
    out_sds = jax.ShapeDtypeStruct((R, F), jnp.float32)

    a1p, a2p, a3p, h4p = pl.pallas_call(
        _mlp_kernel,
        out_shape=(out_sds, out_sds, out_sds, out_sds),
        grid=(ntiles,),
        in_specs=[
            row_tile,                                             # packed x
            pl.BlockSpec((F, F), const), pl.BlockSpec((F, F), const),  # fc1, fc2
            pl.BlockSpec((F, F), const), pl.BlockSpec((F, F), const),  # fc3, out
            pl.BlockSpec((4, F), const),                          # fused biases
        ],
        out_specs=(row_tile, row_tile, row_tile, row_tile),
        compiler_params=pltpu.CompilerParams(
            dimension_semantics=("parallel",)),
    )(xp, w1, w2, w3, w4, b)

    # Unpack: (R,128) -> (Bp,8) is a contiguous row-major reshape.
    a1 = a1p.reshape(Bp, SLOT)[:B]
    a2 = a2p.reshape(Bp, SLOT)[:B]
    a3 = a3p.reshape(Bp, SLOT)[:B]
    x_out = h4p.reshape(Bp, SLOT)[:B, :OUT_DIM]
    # outputs[3] of the PyTorch forward is tanh(logit); it is redundant with
    # x_out, so compute it here instead of spending an EUP pass in the kernel.
    features = [a1, a2, a3, jnp.tanh(x_out)]
    # TODO(synk): manim visualization side effects (random.randint row pick,
    # node_opacities updates, Scene/VGroup plumbing) have no Pallas equivalent.
    return x_out, features


def init_params(key):
    """Deterministic init matching nn.Linear shapes, stored transposed as [in, out]."""
    keys = jax.random.split(key, 8)

    def lin(kw, kb, fan_in, fan_out):
        bound = 1.0 / jnp.sqrt(fan_in)
        w = jax.random.uniform(kw, (fan_in, fan_out), jnp.float32, -bound, bound)
        b = jax.random.uniform(kb, (1, fan_out), jnp.float32, -bound, bound)
        return w, b

    return (lin(keys[0], keys[1], IN_DIM, HIDDEN),
            lin(keys[2], keys[3], HIDDEN, HIDDEN),
            lin(keys[4], keys[5], HIDDEN, HIDDEN),
            lin(keys[6], keys[7], HIDDEN, OUT_DIM))


if __name__ == "__main__":
    key = jax.random.PRNGKey(0)
    kx, kp = jax.random.split(key)

    batch = 37   # deliberately not a multiple of 16 to exercise ragged padding
    x = jax.random.normal(kx, (batch, IN_DIM), dtype=jnp.float32)
    params = init_params(kp)
    packed_params = pack_params(params)   # one-time prep, outside the forward

    x_out, features = visualization_model_forward(x, packed_params)
    (x_out, features) = jax.block_until_ready((x_out, features))

    # Pure-JAX reference of the same forward pass.
    (w1, b1), (w2, b2), (w3, b3), (w4, b4) = params
    a1 = jnp.tanh(x @ w1 + b1)
    a2 = jnp.tanh(a1 @ w2 + b2)
    a3 = jnp.tanh(a2 @ w3 + b3)
    h4 = a3 @ w4 + b4
    t4 = jnp.tanh(h4)

    refs = [h4, a1, a2, a3, t4]
    got = [x_out] + features
    for g, r in zip(got, refs):
        assert g.shape == r.shape and g.dtype == r.dtype
        assert jnp.allclose(g, r, atol=1e-5, rtol=1e-5)

    print("KERNEL_OK")
</pallas_src>

<mosaic_0001>
module attributes {stable_mosaic.version = 11 : i64} {
  func.func @_mlp_kernel(%arg0: i32, %arg1: memref<8x128xf32, #tpu.memory_space<vmem>>, %arg2: memref<128x128xf32, #tpu.memory_space<vmem>>, %arg3: memref<128x128xf32, #tpu.memory_space<vmem>>, %arg4: memref<128x128xf32, #tpu.memory_space<vmem>>, %arg5: memref<128x128xf32, #tpu.memory_space<vmem>>, %arg6: memref<4x128xf32, #tpu.memory_space<vmem>>, %arg7: memref<8x128xf32, #tpu.memory_space<vmem>>, %arg8: memref<8x128xf32, #tpu.memory_space<vmem>>, %arg9: memref<8x128xf32, #tpu.memory_space<vmem>>, %arg10: memref<8x128xf32, #tpu.memory_space<vmem>>) attributes {dimension_semantics = [#tpu.dimension_semantics<parallel>], iteration_bounds = array<i64: 2>, scalar_prefetch = 0 : i64, scratch_operands = 0 : i64, tpu.core_type = #tpu.core_type<tc>, window_params = [{transform_indices = @transform_0, window_bounds = array<i64: 8, 128>}, {pipeline_mode = #tpu.pipeline_mode<synchronous>, transform_indices = @transform_1, window_bounds = array<i64: 128, 128>}, {pipeline_mode = #tpu.pipeline_mode<synchronous>, transform_indices = @transform_2, window_bounds = array<i64: 128, 128>}, {pipeline_mode = #tpu.pipeline_mode<synchronous>, transform_indices = @transform_3, window_bounds = array<i64: 128, 128>}, {pipeline_mode = #tpu.pipeline_mode<synchronous>, transform_indices = @transform_4, window_bounds = array<i64: 128, 128>}, {pipeline_mode = #tpu.pipeline_mode<synchronous>, transform_indices = @transform_5, window_bounds = array<i64: 4, 128>}, {transform_indices = @transform_6, window_bounds = array<i64: 8, 128>}, {transform_indices = @transform_7, window_bounds = array<i64: 8, 128>}, {transform_indices = @transform_8, window_bounds = array<i64: 8, 128>}, {transform_indices = @transform_9, window_bounds = array<i64: 8, 128>}]} {
    %c0 = arith.constant 0 : index
    %c0_0 = arith.constant 0 : index
    %0 = vector.load %arg1[%c0, %c0_0] : memref<8x128xf32, #tpu.memory_space<vmem>>, vector<8x128xf32>
    %c0_1 = arith.constant 0 : index
    %c0_2 = arith.constant 0 : index
    %1 = vector.load %arg2[%c0_1, %c0_2] : memref<128x128xf32, #tpu.memory_space<vmem>>, vector<128x128xf32>
    %cst = arith.constant dense<0.000000e+00> : vector<8x128xf32>
    %2 = tpu.matmul %0, %1, %cst {dimension_numbers = #tpu.dot_dimension_numbers<[1], [0], [0], [1], [0, 0, 1, 1], [], []>} : vector<8x128xf32>, vector<128x128xf32>, vector<8x128xf32> -> vector<8x128xf32>
    %c0_3 = arith.constant 0 : index
    %c0_4 = arith.constant 0 : index
    %3 = vector.load %arg6[%c0_3, %c0_4] : memref<4x128xf32, #tpu.memory_space<vmem>>, vector<1x128xf32>
    %4 = vector.broadcast %3 : vector<1x128xf32> to vector<8x128xf32>
    %5 = arith.addf %2, %4 : vector<8x128xf32>
    %6 = math.tanh %5 : vector<8x128xf32>
    %c0_5 = arith.constant 0 : index
    %c0_6 = arith.constant 0 : index
    %7 = vector.load %arg3[%c0_5, %c0_6] : memref<128x128xf32, #tpu.memory_space<vmem>>, vector<128x128xf32>
    %cst_7 = arith.constant dense<0.000000e+00> : vector<8x128xf32>
    %8 = tpu.matmul %6, %7, %cst_7 {dimension_numbers = #tpu.dot_dimension_numbers<[1], [0], [0], [1], [0, 0, 1, 1], [], []>} : vector<8x128xf32>, vector<128x128xf32>, vector<8x128xf32> -> vector<8x128xf32>
    %c1 = arith.constant 1 : index
    %c0_8 = arith.constant 0 : index
    %9 = vector.load %arg6[%c1, %c0_8] : memref<4x128xf32, #tpu.memory_space<vmem>>, vector<1x128xf32>
    %10 = vector.broadcast %9 : vector<1x128xf32> to vector<8x128xf32>
    %11 = arith.addf %8, %10 : vector<8x128xf32>
    %12 = math.tanh %11 : vector<8x128xf32>
    %c0_9 = arith.constant 0 : index
    %c0_10 = arith.constant 0 : index
    %13 = vector.load %arg4[%c0_9, %c0_10] : memref<128x128xf32, #tpu.memory_space<vmem>>, vector<128x128xf32>
    %cst_11 = arith.constant dense<0.000000e+00> : vector<8x128xf32>
    %14 = tpu.matmul %12, %13, %cst_11 {dimension_numbers = #tpu.dot_dimension_numbers<[1], [0], [0], [1], [0, 0, 1, 1], [], []>} : vector<8x128xf32>, vector<128x128xf32>, vector<8x128xf32> -> vector<8x128xf32>
    %c2 = arith.constant 2 : index
    %c0_12 = arith.constant 0 : index
    %15 = vector.load %arg6[%c2, %c0_12] : memref<4x128xf32, #tpu.memory_space<vmem>>, vector<1x128xf32>
    %16 = vector.broadcast %15 : vector<1x128xf32> to vector<8x128xf32>
    %17 = arith.addf %14, %16 : vector<8x128xf32>
    %18 = math.tanh %17 : vector<8x128xf32>
    %c0_13 = arith.constant 0 : index
    %c0_14 = arith.constant 0 : index
    %19 = vector.load %arg5[%c0_13, %c0_14] : memref<128x128xf32, #tpu.memory_space<vmem>>, vector<128x128xf32>
    %cst_15 = arith.constant dense<0.000000e+00> : vector<8x128xf32>
    %20 = tpu.matmul %18, %19, %cst_15 {dimension_numbers = #tpu.dot_dimension_numbers<[1], [0], [0], [1], [0, 0, 1, 1], [], []>} : vector<8x128xf32>, vector<128x128xf32>, vector<8x128xf32> -> vector<8x128xf32>
    %c3 = arith.constant 3 : index
    %c0_16 = arith.constant 0 : index
    %21 = vector.load %arg6[%c3, %c0_16] : memref<4x128xf32, #tpu.memory_space<vmem>>, vector<1x128xf32>
    %22 = vector.broadcast %21 : vector<1x128xf32> to vector<8x128xf32>
    %23 = arith.addf %20, %22 : vector<8x128xf32>
    %c0_17 = arith.constant 0 : index
    %c0_18 = arith.constant 0 : index
    %24 = vector.load %arg7[%c0_17, %c0_18] : memref<8x128xf32, #tpu.memory_space<vmem>>, vector<8x128xf32>
    tpu.vector_store %arg7[%c0_17, %c0_18], %6 {strides = array<i32>} : memref<8x128xf32, #tpu.memory_space<vmem>>, vector<8x128xf32>,
    %c0_19 = arith.constant 0 : index
    %c0_20 = arith.constant 0 : index
    %25 = vector.load %arg8[%c0_19, %c0_20] : memref<8x128xf32, #tpu.memory_space<vmem>>, vector<8x128xf32>
    tpu.vector_store %arg8[%c0_19, %c0_20], %12 {strides = array<i32>} : memref<8x128xf32, #tpu.memory_space<vmem>>, vector<8x128xf32>,
    %c0_21 = arith.constant 0 : index
    %c0_22 = arith.constant 0 : index
    %26 = vector.load %arg9[%c0_21, %c0_22] : memref<8x128xf32, #tpu.memory_space<vmem>>, vector<8x128xf32>
    tpu.vector_store %arg9[%c0_21, %c0_22], %18 {strides = array<i32>} : memref<8x128xf32, #tpu.memory_space<vmem>>, vector<8x128xf32>,
    %c0_23 = arith.constant 0 : index
    %c0_24 = arith.constant 0 : index
    %27 = vector.load %arg10[%c0_23, %c0_24] : memref<8x128xf32, #tpu.memory_space<vmem>>, vector<8x128xf32>
    tpu.vector_store %arg10[%c0_23, %c0_24], %23 {strides = array<i32>} : memref<8x128xf32, #tpu.memory_space<vmem>>, vector<8x128xf32>,
    return
  }
  func.func @transform_0(%arg0: i32) -> (i32, i32) {
    %c0_i32 = arith.constant 0 : i32
    %c0_i32_0 = arith.constant 0 : i32
    return %arg0, %c0_i32 : i32, i32
  }
  func.func @transform_1(%arg0: i32) -> (i32, i32) {
    %c0_i32 = arith.constant 0 : i32
    %c0_i32_0 = arith.constant 0 : i32
    %c0_i32_1 = arith.constant 0 : i32
    return %c0_i32, %c0_i32_0 : i32, i32
  }
  func.func @transform_2(%arg0: i32) -> (i32, i32) {
    %c0_i32 = arith.constant 0 : i32
    %c0_i32_0 = arith.constant 0 : i32
    %c0_i32_1 = arith.constant 0 : i32
    return %c0_i32, %c0_i32_0 : i32, i32
  }
  func.func @transform_3(%arg0: i32) -> (i32, i32) {
    %c0_i32 = arith.constant 0 : i32
    %c0_i32_0 = arith.constant 0 : i32
    %c0_i32_1 = arith.constant 0 : i32
    return %c0_i32, %c0_i32_0 : i32, i32
  }
  func.func @transform_4(%arg0: i32) -> (i32, i32) {
    %c0_i32 = arith.constant 0 : i32
    %c0_i32_0 = arith.constant 0 : i32
    %c0_i32_1 = arith.constant 0 : i32
    return %c0_i32, %c0_i32_0 : i32, i32
  }
  func.func @transform_5(%arg0: i32) -> (i32, i32) {
    %c0_i32 = arith.constant 0 : i32
    %c0_i32_0 = arith.constant 0 : i32
    %c0_i32_1 = arith.constant 0 : i32
    return %c0_i32, %c0_i32_0 : i32, i32
  }
  func.func @transform_6(%arg0: i32) -> (i32, i32) {
    %c0_i32 = arith.constant 0 : i32
    %c0_i32_0 = arith.constant 0 : i32
    return %arg0, %c0_i32 : i32, i32
  }
  func.func @transform_7(%arg0: i32) -> (i32, i32) {
    %c0_i32 = arith.constant 0 : i32
    %c0_i32_0 = arith.constant 0 : i32
    return %arg0, %c0_i32 : i32, i32
  }
  func.func @transform_8(%arg0: i32) -> (i32, i32) {
    %c0_i32 = arith.constant 0 : i32
    %c0_i32_0 = arith.constant 0 : i32
    return %arg0, %c0_i32 : i32, i32
  }
  func.func @transform_9(%arg0: i32) -> (i32, i32) {
    %c0_i32 = arith.constant 0 : i32
    %c0_i32_0 = arith.constant 0 : i32
    return %arg0, %c0_i32 : i32, i32
  }
}

</mosaic_0001>

<bundles_post_ra>
// kernel: visualization_model_forward.1
= control target key start
LH: loop header
LB: loop body
LE: loop exit
PB: predicated region body
PF: predicated region fallthrough
CT: control target
= control target key end

     0   :  { %s1275_s30 = smov 0   ;;  %s1556_s0 = inlined_call_operand.vmem [shape: f32[16,128], index: 0, kind: input, shape index: {}]   ;;  %s1557_s1 = inlined_call_operand.vmem [shape: f32[128,128], index: 1, kind: input, shape index: {}]   ;;  %s1558_s2 = inlined_call_operand.vmem [shape: f32[128,128], index: 2, kind: input, shape index: {}]   ;;  %s1559_s3 = inlined_call_operand.vmem [shape: f32[128,128], index: 3, kind: input, shape index: {}]   ;;  %s1560_s4 = inlined_call_operand.vmem [shape: f32[128,128], index: 4, kind: input, shape index: {}]   ;;  %s1561_s5 = inlined_call_operand.vmem [shape: f32[4,128], index: 5, kind: input, shape index: {}]   ;;  %s1562_s6 = inlined_call_operand.vmem [shape: f32[16,128], index: 6, kind: output, shape index: {0}]   ;;  %s1563_s7 = inlined_call_operand.vmem [shape: f32[16,128], index: 7, kind: output, shape index: {1}]   ;;  %s1564_s8 = inlined_call_operand.vmem [shape: f32[16,128], index: 8, kind: output, shape index: {2}]   ;;  %s1565_s9 = inlined_call_operand.vmem [shape: f32[16,128], index: 9, kind: output, shape index: {3}]  }
   0x1 LB: > { %s877_s10 = sadd.s32 4294967295, %s1220_s30   ;;  %p881_p0 = scmp.ge.s32.totalorder %s1220_s30, 1  ;;  %s1220_s30 = sphi %s1275_s30, %s20_s30  }
   0x2   : > { %p293_p1 = scmp.lt.s32.totalorder %s1220_s30, 3 }
   0x4   : > { %p294_p2 = pnand %p881_p0, %p293_p1 }
   0x5   : > { %v360_v0 = vld [vmem:[%s1557_s1] sm:$0xff] (!%p294_p2)  ;;  %v361_v1 = vld [vmem:[%s1557_s1 + $0x8] sm:$0xff] (!%p294_p2)  ;;  %v362_v2 = vld [vmem:[%s1557_s1 + $0x10] sm:$0xff] (!%p294_p2)  ;;  %v1222_v3 = vmov (!%p294_p2), 0.0|0.0   ;;  %vm1223_vm0 = vmmov (!%p294_p2), 0   ;;  %v1224_v6 = vmov (!%p294_p2), 0.0  }
   0x6   : > { %297 = sbr.rel (%p294_p2) target bundleno = 929 (0x3a1), region = 44  ;;  %1101 = vmatprep.subr.bf16.mxu0 (!%p294_p2), %v1222_v3  ;;  %v1102_v4 = vpack.c.bf16 (!%p294_p2), %v361_v1, %v360_v0  ;;  %v363_v5 = vld [vmem:[%s1557_s1 + $0x18] sm:$0xff] (!%p294_p2)  ;;  %993 = vmatprep.mubr.msk.f32.mxu0 (!%p294_p2), %vm1223_vm0, %v1224_v6  ;;  %v364_v8 = vld [vmem:[%s1557_s1 + $0x20] sm:$0xff] (!%p294_p2)  ;;  %v365_v9 = vld [vmem:[%s1557_s1 + $0x28] sm:$0xff] (!%p294_p2)  ;;  %p339_p3 = scmp.lt.s32.totalorder (!%p294_p2), %s877_s10, 1 }
   0x7   : > { %1125 = vmatprep.subr.bf16.mxu1 (!%p294_p2), %v1222_v3  ;;  %1028 = vmatprep.mubr.msk.f32.mxu1 (!%p294_p2), %vm1223_vm0, %v1224_v6  ;;  %v1105_v7 = vpack.c.bf16 (!%p294_p2), %v363_v5, %v362_v2  ;;  %v452_v10 = vld [vmem:[%s1558_s2] sm:$0xff] (!%p294_p2)  ;;  %v453_v11 = vld [vmem:[%s1558_s2 + $0x8] sm:$0xff] (!%p294_p2)  ;;  %v454_v13 = vld [vmem:[%s1558_s2 + $0x10] sm:$0xff] (!%p294_p2)  ;;  %v1108_v15 = vpack.c.bf16 (!%p294_p2), %v365_v9, %v364_v8 }
   0x8   : > { %1103 = vmatpush3.bf16.msra.mxu0 (!%p294_p2), %v1102_v4  ;;  %v1126_v12 = vpack.c.bf16 (!%p294_p2), %v453_v11, %v452_v10  ;;  %v455_v14 = vld [vmem:[%s1558_s2 + $0x18] sm:$0xff] (!%p294_p2)  ;;  %v366_v16 = vld [vmem:[%s1557_s1 + $0x30] sm:$0xff] (!%p294_p2)  ;;  %v456_v19 = vld [vmem:[%s1558_s2 + $0x20] sm:$0xff] (!%p294_p2) }
   0x9   : > { %1104 = vmatprep.subr.bf16.mxu0 (!%p294_p2), %v1222_v3  ;;  %v367_v17 = vld [vmem:[%s1557_s1 + $0x38] sm:$0xff] (!%p294_p2)  ;;  %v1129_v18 = vpack.c.bf16 (!%p294_p2), %v455_v14, %v454_v13  ;;  %v457_v20 = vld [vmem:[%s1558_s2 + $0x28] sm:$0xff] (!%p294_p2)  ;;  %v368_v22 = vld [vmem:[%s1557_s1 + $0x40] sm:$0xff] (!%p294_p2) }
   0xa   : > { %1127 = vmatpush3.bf16.msra.mxu1 (!%p294_p2), %v1126_v12  ;;  %v1111_v21 = vpack.c.bf16 (!%p294_p2), %v367_v17, %v366_v16  ;;  %v369_v23 = vld [vmem:[%s1557_s1 + $0x48] sm:$0xff] (!%p294_p2)  ;;  %v1132_v24 = vpack.c.bf16 (!%p294_p2), %v457_v20, %v456_v19  ;;  %v458_v25 = vld [vmem:[%s1558_s2 + $0x30] sm:$0xff] (!%p294_p2)  ;;  %v459_v26 = vld [vmem:[%s1558_s2 + $0x38] sm:$0xff] (!%p294_p2) }
   0xb   : > { %1128 = vmatprep.subr.bf16.mxu1 (!%p294_p2), %v1222_v3  ;;  %v1114_v27 = vpack.c.bf16 (!%p294_p2), %v369_v23, %v368_v22  ;;  %v370_v28 = vld [vmem:[%s1557_s1 + $0x50] sm:$0xff] (!%p294_p2)  ;;  %v371_v29 = vld [vmem:[%s1557_s1 + $0x58] sm:$0xff] (!%p294_p2)  ;;  %v1135_v30 = vpack.c.bf16 (!%p294_p2), %v459_v26, %v458_v25  ;;  %v460_v31 = vld [vmem:[%s1558_s2 + $0x40] sm:$0xff] (!%p294_p2) }
   0xc   : > { %1106 = vmatpush3.bf16.msra.mxu0 (!%p294_p2), %v1105_v7  ;;  %v461_v32 = vld [vmem:[%s1558_s2 + $0x48] sm:$0xff] (!%p294_p2)  ;;  %v1117_v33 = vpack.c.bf16 (!%p294_p2), %v371_v29, %v370_v28  ;;  %v372_v34 = vld [vmem:[%s1557_s1 + $0x60] sm:$0xff] (!%p294_p2)  ;;  %v374_v38 = vld [vmem:[%s1557_s1 + $0x70] sm:$0xff] (!%p294_p2) }
   0xd   : > { %1107 = vmatprep.subr.bf16.mxu0 %v1222_v3  ;;  %v373_v35 = vld [vmem:[%s1557_s1 + $0x68] sm:$0xff]  ;;  %v1138_v36 = vpack.c.bf16 %v461_v32, %v460_v31  ;;  %s1567_s10 = smov (!%p339_p3, %s877_s10), 1  ;;  %v375_v39 = vld [vmem:[%s1557_s1 + $0x78] sm:$0xff]  ;;  %v462_v42 = vld [vmem:[%s1558_s2 + $0x50] sm:$0xff] }
   0xe   : > { %1130 = vmatpush3.bf16.msra.mxu1 %v1129_v18  ;;  %v1120_v37 = vpack.c.bf16 %v373_v35, %v372_v34  ;;  %s1381_s25 = sshll.u32 %s1567_s10, 3  ;;  %v1123_v40 = vpack.c.bf16 %v375_v39, %v374_v38  ;;  %v463_v43 = vld [vmem:[%s1558_s2 + $0x58] sm:$0xff]  ;;  %v464_v45 = vld [vmem:[%s1558_s2 + $0x60] sm:$0xff]  ;;  %v465_v46 = vld [vmem:[%s1558_s2 + $0x68] sm:$0xff] }
   0xf   : > { %1131 = vmatprep.subr.bf16.mxu1 %v1222_v3  ;;  %s342_s28 = scalar_lea.vmem %s1556_s0, %s1381_s25  ;;  %v1141_v44 = vpack.c.bf16 %v463_v43, %v462_v42  ;;  %v1144_v47 = vpack.c.bf16 %v465_v46, %v464_v45  ;;  %v466_v48 = vld [vmem:[%s1558_s2 + $0x70] sm:$0xff]  ;;  %v467_v49 = vld [vmem:[%s1558_s2 + $0x78] sm:$0xff]  ;;  %v544_v51 = vld [vmem:[%s1559_s3] sm:$0xff]  ;;  %s346_s27 = scalar_lea.vmem %s1562_s6, %s1381_s25 }
  0x10   : > { %1109 = vmatpush3.bf16.msra.mxu0 %v1108_v15  ;;  %v359_v41 = vld [vmem:[%s342_s28] sm:$0xff]  ;;  %v1147_v50 = vpack.c.bf16 %v467_v49, %v466_v48  ;;  %v545_v52 = vld [vmem:[%s1559_s3 + $0x8] sm:$0xff]  ;;  %v546_v53 = vld [vmem:[%s1559_s3 + $0x10] sm:$0xff]  ;;  %s350_s26 = scalar_lea.vmem %s1563_s7, %s1381_s25  ;;  %s354_s23 = scalar_lea.vmem %s1564_s8, %s1381_s25 }
  0x11   : > { %1110 = vmatprep.subr.bf16.mxu0 %v1222_v3  ;;  %v1150_v54 = vpack.c.bf16 %v545_v52, %v544_v51  ;;  %v547_v55 = vld [vmem:[%s1559_s3 + $0x18] sm:$0xff]  ;;  %v548_v57 = vld [vmem:[%s1559_s3 + $0x20] sm:$0xff]  ;;  %v549_v58 = vld [vmem:[%s1559_s3 + $0x28] sm:$0xff]  ;;  %s358_s10 = scalar_lea.vmem %s1565_s9, %s1381_s25 }
  0x12   : > { %1133 = vmatpush3.bf16.msra.mxu1 %v1132_v24  ;;  %v1153_v56 = vpack.c.bf16 %v547_v55, %v546_v53  ;;  %v1156_v59 = vpack.c.bf16 %v549_v58, %v548_v57  ;;  %v550_v60 = vld [vmem:[%s1559_s3 + $0x30] sm:$0xff]  ;;  %v551_v61 = vld [vmem:[%s1559_s3 + $0x38] sm:$0xff]  ;;  %v552_v63 = vld [vmem:[%s1559_s3 + $0x40] sm:$0xff] }
  0x13   : > { %1134 = vmatprep.subr.bf16.mxu1 %v1222_v3  ;;  %v1159_v62 = vpack.c.bf16 %v551_v61, %v550_v60  ;;  %v553_v0 = vld [vmem:[%s1559_s3 + $0x48] sm:$0xff]  ;;  %v887_v2 = vld [vmem:[%s1561_s5] ss:$0 sm:$0xff]  ;;  %v554_v9 = vld [vmem:[%s1559_s3 + $0x50] sm:$0xff] }
  0x14   : > { %1112 = vmatpush3.bf16.msra.mxu0 %v1111_v21  ;;  %v1162_v1 = vpack.c.bf16 %v553_v0, %v552_v63  ;;  %v555_v10 = vld [vmem:[%s1559_s3 + $0x58] sm:$0xff]  ;;  %v556_v12 = vld [vmem:[%s1559_s3 + $0x60] sm:$0xff]  ;;  %v558_v14 = vld [vmem:[%s1559_s3 + $0x70] sm:$0xff] }
  0x15   : > { %1113 = vmatprep.subr.bf16.mxu0 %v1222_v3  ;;  %v1165_v11 = vpack.c.bf16 %v555_v10, %v554_v9  ;;  %v559_v15 = vld [vmem:[%s1559_s3 + $0x78] sm:$0xff]  ;;  %v636_v17 = vld [vmem:[%s1560_s4] sm:$0xff]  ;;  %v637_v18 = vld [vmem:[%s1560_s4 + $0x8] sm:$0xff] }
  0x16   : > { %1136 = vmatpush3.bf16.msra.mxu1 %v1135_v30  ;;  %v1171_v16 = vpack.c.bf16 %v559_v15, %v558_v14  ;;  %v638_v19 = vld [vmem:[%s1560_s4 + $0x10] sm:$0xff]  ;;  %v1174_v20 = vpack.c.bf16 %v637_v18, %v636_v17  ;;  %v639_v21 = vld [vmem:[%s1560_s4 + $0x18] sm:$0xff]  ;;  %v640_v23 = vld [vmem:[%s1560_s4 + $0x20] sm:$0xff] }
  0x17   : > { %1137 = vmatprep.subr.bf16.mxu1 %v1222_v3  ;;  %v1177_v22 = vpack.c.bf16 %v639_v21, %v638_v19  ;;  %v641_v24 = vld [vmem:[%s1560_s4 + $0x28] sm:$0xff]  ;;  %v642_v26 = vld [vmem:[%s1560_s4 + $0x30] sm:$0xff]  ;;  %v644_v29 = vld [vmem:[%s1560_s4 + $0x40] sm:$0xff] }
  0x18   : > { %1115 = vmatpush3.bf16.msra.mxu0 %v1114_v27  ;;  %v1180_v25 = vpack.c.bf16 %v641_v24, %v640_v23  ;;  %v643_v27 = vld [vmem:[%s1560_s4 + $0x38] sm:$0xff]  ;;  %v645_v30 = vld [vmem:[%s1560_s4 + $0x48] sm:$0xff]  ;;  %v888_v32 = vld [vmem:[%s1561_s5 + $0x1] ss:$0 sm:$0xff] }
  0x19   : > { %1116 = vmatprep.subr.bf16.mxu0 %v1222_v3  ;;  %v1183_v28 = vpack.c.bf16 %v643_v27, %v642_v26  ;;  %v1186_v31 = vpack.c.bf16 %v645_v30, %v644_v29  ;;  %v647_v38 = vld [vmem:[%s1560_s4 + $0x58] sm:$0xff]  ;;  %v650_v43 = vld [vmem:[%s1560_s4 + $0x70] sm:$0xff]  ;;  %v889_v46 = vld [vmem:[%s1561_s5 + $0x2] ss:$0 sm:$0xff] }
  0x1a   : > { %1139 = vmatpush3.bf16.msra.mxu1 %v1138_v36 }
  0x1b   : > { %1140 = vmatprep.subr.bf16.mxu1 %v1222_v3 }
  0x1c   : > { %1118 = vmatpush3.bf16.msra.mxu0 %v1117_v33 }
  0x1d   : > { %1119 = vmatprep.subr.bf16.mxu0 %v1222_v3 }
  0x1e   : > { %1142 = vmatpush3.bf16.msra.mxu1 %v1141_v44  ;;  %v651_v44 = vld [vmem:[%s1560_s4 + $0x78] sm:$0xff] }
  0x1f   : > { %1143 = vmatprep.subr.bf16.mxu1 %v1222_v3  ;;  %v1195_v45 = vpack.c.bf16 %v651_v44, %v650_v43 }
  0x20   : > { %1121 = vmatpush3.bf16.msra.mxu0 %v1120_v37  ;;  %v646_v37 = vld [vmem:[%s1560_s4 + $0x50] sm:$0xff] }
  0x21   : > { %1122 = vmatprep.subr.bf16.mxu0 %v1222_v3  ;;  %v1189_v39 = vpack.c.bf16 %v647_v38, %v646_v37 }
  0x22   : > { %1145 = vmatpush3.bf16.msra.mxu1 %v1144_v47 }
  0x23   : > { %1146 = vmatprep.subr.bf16.mxu1 %v1222_v3 }
  0x24   : > { %1124 = vmatpush3.bf16.msra.mxu0 %v1123_v40  ;;  %v648_v40 = vld [vmem:[%s1560_s4 + $0x60] sm:$0xff] }
  0x25   : > { %1149 = vmatprep.subr.bf16.mxu0 %v1222_v3 }
  0x26   : > { %1148 = vmatpush3.bf16.msra.mxu1 %v1147_v50  ;;  %v890_v50 = vld [vmem:[%s1561_s5 + $0x3] ss:$0 sm:$0xff] }
  0x27   : > { %994 = vmatmul.mubr.f32.vlgmr.msra.gmra.mrb[0].mxu0 %v359_v41  ;;  %1173 = vmatprep.subr.bf16.mxu1 %v1222_v3  ;;  %v649_v41 = vld [vmem:[%s1560_s4 + $0x68] sm:$0xff] }
  0x28   : > { %1063 = vmatprep.mubr.msk.f32.mxu0 %vm1223_vm0, %v1224_v6  ;;  %1151 = vmatpush3.bf16.msra.mxu0 %v1150_v54  ;;  %v1192_v42 = vpack.c.bf16 %v649_v41, %v648_v40 }
  0x29   : > { %1152 = vmatprep.subr.bf16.mxu0 %v1222_v3 }
  0x2c   : > { %1154 = vmatpush3.bf16.msra.mxu0 %v1153_v56 }
  0x2d   : > { %1155 = vmatprep.subr.bf16.mxu0 %v1222_v3 }
  0x30   : > { %1157 = vmatpush3.bf16.msra.mxu0 %v1156_v59 }
  0x31   : > { %1158 = vmatprep.subr.bf16.mxu0 %v1222_v3 }
  0x34   : > { %1160 = vmatpush3.bf16.msra.mxu0 %v1159_v62 }
  0x35   : > { %1161 = vmatprep.subr.bf16.mxu0 %v1222_v3 }
  0x38   : > { %1163 = vmatpush3.bf16.msra.mxu0 %v1162_v1 }
  0x39   : > { %1164 = vmatprep.subr.bf16.mxu0 %v1222_v3 }
  0x3c   : > { %1166 = vmatpush3.bf16.msra.mxu0 %v1165_v11 }
  0x3d   : > { %1167 = vmatprep.subr.bf16.mxu0 %v1222_v3 }
  0xfa   : > { %v447_v4 = vpop.f32.mrb[0].mxu0 }
  0xfb   : > { %v448_v5 = vadd.f32 %v887_v2, %v447_v4  ;;  %v995_v7 = vpop.f32.mrb[1].mxu0 }
  0xfd   : > { %1208 = vtanh.f32 %v448_v5 }
 0x107   : > { %v1209_v8 = vpop.eup %1208 }
 0x108   : > { %727 = vst [vmem:[%s346_s27] sm:$0xff] %v1209_v8  ;;  %1029 = vmatmul.mubr.f32.vlgmr.msra.gmra.mrb[0].mxu1 %v1209_v8 }
 0x109   : > { %1098 = vmatprep.mubr.msk.f32.mxu1 %vm1223_vm0, %v1224_v6  ;;  %v557_v6 = vld [vmem:[%s1559_s3 + $0x68] sm:$0xff]  ;;  %1175 = vmatpush3.bf16.msra.mxu1 %v1174_v20 }
 0x10a   : > { %v1168_v13 = vpack.c.bf16 %v557_v6, %v556_v12  ;;  %1176 = vmatprep.subr.bf16.mxu1 %v1222_v3 }
 0x10c   : > { %1169 = vmatpush3.bf16.msra.mxu0 %v1168_v13 }
 0x10d   : > { %1170 = vmatprep.subr.bf16.mxu0 %v1222_v3  ;;  %1178 = vmatpush3.bf16.msra.mxu1 %v1177_v22 }
 0x10e   : > { %1179 = vmatprep.subr.bf16.mxu1 %v1222_v3 }
 0x110   : > { %1172 = vmatpush3.bf16.msra.mxu0 %v1171_v16 }
 0x111   : > { %1181 = vmatpush3.bf16.msra.mxu1 %v1180_v25 }
 0x112   : > { %1182 = vmatprep.subr.bf16.mxu1 %v1222_v3 }
 0x115   : > { %1184 = vmatpush3.bf16.msra.mxu1 %v1183_v28 }
 0x116   : > { %1185 = vmatprep.subr.bf16.mxu1 %v1222_v3 }
 0x119   : > { %1187 = vmatpush3.bf16.msra.mxu1 %v1186_v31 }
 0x11a   : > { %1188 = vmatprep.subr.bf16.mxu1 %v1222_v3 }
 0x11d   : > { %1190 = vmatpush3.bf16.msra.mxu1 %v1189_v39 }
 0x11e   : > { %1191 = vmatprep.subr.bf16.mxu1 %v1222_v3 }
 0x121   : > { %1193 = vmatpush3.bf16.msra.mxu1 %v1192_v42 }
 0x122   : > { %1194 = vmatprep.subr.bf16.mxu1 %v1222_v3 }
 0x125   : > { %1196 = vmatpush3.bf16.msra.mxu1 %v1195_v45 }
 0x1db   : > { %v539_v33 = vpop.f32.mrb[0].mxu1 }
 0x1dc   : > { %v540_v34 = vadd.f32 %v888_v32, %v539_v33  ;;  %v1030_v35 = vpop.f32.mrb[1].mxu1 }
 0x1de   : > { %1210 = vtanh.f32 %v540_v34 }
 0x1e8   : > { %v1211_v36 = vpop.eup %1210 }
 0x1e9   : > { %728 = vst [vmem:[%s350_s26] sm:$0xff] %v1211_v36  ;;  %1064 = vmatmul.mubr.f32.vlgmr.msra.gmra.mrb[2].mxu0 %v1211_v36 }
 0x2bc   : > { %v631_v47 = vpop.f32.mrb[2].mxu0 }
 0x2bd   : > { %v632_v48 = vadd.f32 %v889_v46, %v631_v47  ;;  %v1065_v49 = vpop.f32.mrb[3].mxu0 }
 0x2bf   : > { %1212 = vtanh.f32 %v632_v48 }
 0x2c9   : > { %v1213_v3 = vpop.eup %1212 }
 0x2ca   : > { %729 = vst [vmem:[%s354_s23] sm:$0xff] %v1213_v3  ;;  %1099 = vmatmul.mubr.f32.vlgmr.msra.gmra.mrb[2].mxu1 %v1213_v3 }
 0x39d   : > { %v723_v51 = vpop.f32.mrb[2].mxu1 }
 0x39e   : > { %v724_v52 = vadd.f32 %v890_v50, %v723_v51  ;;  %v1100_v53 = vpop.f32.mrb[3].mxu1 }
 0x3a0   : > { %730 = vst [vmem:[%s358_s10] sm:$0xff] %v724_v52 }
 0x3a1 PF: > { %s20_s30 = sadd.s32 1, %s1220_s30  }
 0x3a2   : > { %p17_p4 = scmp.ge.s32.totalorder %s20_s30, 4  }
 0x3a4   :  { %19 = sbr.rel (!%p17_p4) target bundleno = 1 (0x1), region = 110 }

</bundles_post_ra>
